<compile_context>
chip_gen: v7x
topology: tpu7x:2x2x1
jax: 0.10.0
libtpu: 0.0.40
codegen_flags: <defaults>
</compile_context>

<pallas_src>
import functools

import jax
import jax.numpy as jnp
from jax import lax
from jax.experimental import pallas as pl
from jax.experimental.pallas import tpu as pltpu

LN_EPS = 1e-5  # PyTorch nn.LayerNorm default


# -----------------------------------------------------------------------------
# Kernel
# -----------------------------------------------------------------------------
def actor_kernel(x_ref, w0_ref, w_ref, vec_ref, o_ref, *, inv_dims):
    """One batch tile: 5x (matmul + LayerNorm + ReLU) + matmul + tanh.

    x_ref  : (tile_b, num_inputs) f32   activations at their real width
    w0_ref : (num_inputs, D) bf16       first-layer weight (zero-padded cols)
    w_ref  : (n_hidden, D, D) bf16      hidden weights 2..n + output weight
    vec_ref: (3*n_hidden + 1, D) f32    [b, gamma, beta] per hidden layer + b_out
                                        (zero in padded lanes)
    o_ref  : (tile_b, D) f32            lane-dense padded output (tanh)
    inv_dims: static tuple of 1/d_real per hidden layer
    """
    cdt = w0_ref.dtype  # matmul compute dtype (bf16)
    n_hidden = len(inv_dims)

    h = x_ref[...].astype(cdt)
    for li in range(n_hidden):  # static & tiny -> fully unrolled
        if li == 0:
            z = jnp.dot(h, w0_ref[...], preferred_element_type=jnp.float32)
        else:
            z = jnp.dot(h, w_ref[li - 1], preferred_element_type=jnp.float32)
        z = z + vec_ref[3 * li][None, :]                       # bias

        # One-pass LayerNorm over the real features (padded lanes of z are 0).
        inv_d = inv_dims[li]                                   # static scalar
        s1 = jnp.sum(z, axis=-1, keepdims=True)
        s2 = jnp.sum(z * z, axis=-1, keepdims=True)
        mu = s1 * inv_d
        var = s2 * inv_d - mu * mu
        scale = lax.rsqrt(var + LN_EPS) * vec_ref[3 * li + 1][None, :]  # gamma
        z = (z - mu) * scale + vec_ref[3 * li + 2][None, :]             # beta
        h = jnp.maximum(z, 0.0).astype(cdt)                    # padded lanes stay 0

    out = jnp.dot(h, w_ref[n_hidden - 1], preferred_element_type=jnp.float32)
    out = out + vec_ref[3 * n_hidden][None, :]
    o_ref[...] = jnp.tanh(out).astype(o_ref.dtype)


# -----------------------------------------------------------------------------
# Parameter packing (pad feature dims to 128, stack, cast matmul operands)
# -----------------------------------------------------------------------------
def pack_params(params, num_inputs, hidden_sizes, num_outputs, D, compute_dtype):
    n_hidden = len(hidden_sizes)
    dims = [num_inputs] + list(hidden_sizes)

    # First-layer weight at the real input width.
    w0 = jnp.zeros((num_inputs, D), jnp.float32).at[:, :dims[1]].set(params[0])

    # Hidden weights 2..n plus the output weight, stacked.
    w_s = jnp.zeros((n_hidden, D, D), jnp.float32)
    for li in range(1, n_hidden):
        w = params[4 * li]
        w_s = w_s.at[li - 1, :dims[li], :dims[li + 1]].set(w)
    w_out, b_out = params[-2], params[-1]
    w_s = w_s.at[n_hidden - 1, :dims[-1], :num_outputs].set(w_out)

    # Per-layer vectors: [b, gamma, beta] * n_hidden + [b_out].
    vec = jnp.zeros((3 * n_hidden + 1, D), jnp.float32)
    for li in range(n_hidden):
        _, b, g, be = params[4 * li: 4 * li + 4]
        d_out = dims[li + 1]
        vec = vec.at[3 * li + 0, :d_out].set(b)
        vec = vec.at[3 * li + 1, :d_out].set(g)
        vec = vec.at[3 * li + 2, :d_out].set(be)
    vec = vec.at[3 * n_hidden, :num_outputs].set(b_out)

    return w0.astype(compute_dtype), w_s.astype(compute_dtype), vec


# -----------------------------------------------------------------------------
# Wrapper
# -----------------------------------------------------------------------------
def actor_forward(x, params, hidden_sizes, num_outputs, *,
                  compute_dtype=jnp.bfloat16, max_tile_b=512):
    """x: (B, num_inputs) f32; params: flat [W,b,gamma,beta]*n_hidden + [W_out,b_out]."""
    B, num_inputs = x.shape
    n_hidden = len(hidden_sizes)

    # Lane width for hidden/output features (the input keeps its real width).
    max_dim = max(list(hidden_sizes) + [num_outputs])
    D = 128 * pl.cdiv(max_dim, 128)

    w0, w_s, vec = pack_params(params, num_inputs, hidden_sizes, num_outputs,
                               D, compute_dtype)

    # Batch tiling: one tile for tiny batches; >=2 parallel tiles for larger
    # batches (both v7x TensorCores busy); capped at max_tile_b rows per tile.
    if B <= 64:
        tile_b = 8 * pl.cdiv(B, 8)
    else:
        tile_b = min(max_tile_b, 8 * pl.cdiv(pl.cdiv(B, 2), 8))
    grid = (pl.cdiv(B, tile_b),)

    inv_dims = tuple(1.0 / float(d) for d in hidden_sizes)

    # Parameters use constant index_maps -> loaded once, resident across grid.
    in_specs = [
        pl.BlockSpec((tile_b, num_inputs), lambda i: (i, 0)),   # x tile (real width)
        pl.BlockSpec(w0.shape, lambda i: (0, 0)),               # W0
        pl.BlockSpec(w_s.shape, lambda i: (0, 0, 0)),           # stacked W2..Wn + W_out
        pl.BlockSpec(vec.shape, lambda i: (0, 0)),              # stacked vectors
    ]

    out = pl.pallas_call(
        functools.partial(actor_kernel, inv_dims=inv_dims),
        out_shape=jax.ShapeDtypeStruct((B, D), jnp.float32),
        grid_spec=pltpu.PrefetchScalarGridSpec(
            num_scalar_prefetch=0,
            grid=grid,
            in_specs=in_specs,
            out_specs=pl.BlockSpec((tile_b, D), lambda i: (i, 0)),
        ),
        compiler_params=pltpu.CompilerParams(
            dimension_semantics=("parallel",)),
    )(x, w0, w_s, vec)

    # TODO(synk): downstream consumers that accept the padded (B, D) layout can
    # skip this lane slice entirely.
    return out[:, :num_outputs]


# -----------------------------------------------------------------------------
# Deterministic synthetic parameters + pure-JAX reference
# -----------------------------------------------------------------------------
def init_params(key, num_inputs, hidden_sizes, num_outputs):
    dims = [num_inputs] + list(hidden_sizes)
    params = []
    keys = jax.random.split(key, 4 * len(hidden_sizes) + 2)
    ki = 0
    for li in range(len(hidden_sizes)):
        d_in, d_out = dims[li], dims[li + 1]
        w = jax.random.normal(keys[ki], (d_in, d_out), jnp.float32) * 0.1
        b = jax.random.normal(keys[ki + 1], (d_out,), jnp.float32) * 0.01
        gamma = 1.0 + 0.05 * jax.random.normal(keys[ki + 2], (d_out,), jnp.float32)
        beta = 0.01 * jax.random.normal(keys[ki + 3], (d_out,), jnp.float32)
        params += [w, b, gamma, beta]
        ki += 4
    w_out = jax.random.normal(keys[-2], (dims[-1], num_outputs), jnp.float32) * 0.1
    b_out = 0.01 * jax.random.normal(keys[-1], (num_outputs,), jnp.float32)
    params += [w_out, b_out]          # (was missing before -> pack_params crash)
    return params


def actor_reference(x, params, n_layers=5, compute_dtype=None):
    """Pure-JAX mirror of the PyTorch forward.

    If compute_dtype is set, matmul operands are cast like the kernel does
    (f32 accumulation) so the comparison is tight.
    """
    def mm(a, w):
        if compute_dtype is not None:
            a = a.astype(compute_dtype)
            w = w.astype(compute_dtype)
        return jnp.dot(a, w, preferred_element_type=jnp.float32)

    h = x
    for li in range(n_layers):
        w, b, g, be = params[4 * li: 4 * li + 4]
        h = mm(h, w) + b
        mu = jnp.mean(h, axis=-1, keepdims=True)
        var = jnp.mean((h - mu) ** 2, axis=-1, keepdims=True)
        h = (h - mu) / jnp.sqrt(var + LN_EPS) * g + be
        h = jnp.maximum(h, 0.0)
    w_out, b_out = params[-2:]
    return jnp.tanh(mm(h, w_out) + b_out)


if __name__ == "__main__":
    # Small shapes consistent with the module: hidden_size is a 5-element list,
    # num_inputs is the observation dim, action_space.shape[0] is num_outputs.
    batch = 16
    num_inputs = 32
    hidden_sizes = (64, 64, 64, 64, 64)
    num_outputs = 8

    key = jax.random.PRNGKey(0)
    k_x, k_p = jax.random.split(key)
    x = jax.random.normal(k_x, (batch, num_inputs), jnp.float32)
    params = init_params(k_p, num_inputs, hidden_sizes, num_outputs)

    out = actor_forward(x, params, hidden_sizes, num_outputs,
                        compute_dtype=jnp.bfloat16)
    out = jax.block_until_ready(out)
    assert out.shape == (batch, num_outputs)

    # Tight check against a reference that mirrors the kernel's bf16-matmul /
    # f32-everything-else arithmetic (only the one-pass LN formula differs).
    ref_mirror = actor_reference(x, params, compute_dtype=jnp.bfloat16)
    assert jnp.allclose(out, ref_mirror, atol=5e-3, rtol=5e-3), (
        float(jnp.max(jnp.abs(out - ref_mirror))))

    # Loose sanity check against the full-f32 PyTorch-equivalent forward
    # (only bf16 matmul rounding separates the two).
    ref_f32 = actor_reference(x, params)
    assert jnp.allclose(out, ref_f32, atol=1e-1, rtol=1e-1), (
        float(jnp.max(jnp.abs(out - ref_f32))))

    print("KERNEL_OK")
</pallas_src>

<mosaic_0001>
module attributes {stable_mosaic.version = 11 : i64} {
  func.func @actor_kernel(%arg0: i32, %arg1: memref<16x32xf32, #tpu.memory_space<vmem>>, %arg2: memref<32x128xbf16, #tpu.memory_space<vmem>>, %arg3: memref<5x128x128xbf16, #tpu.memory_space<vmem>>, %arg4: memref<16x128xf32, #tpu.memory_space<vmem>>, %arg5: memref<16x128xf32, #tpu.memory_space<vmem>>) attributes {dimension_semantics = [#tpu.dimension_semantics<parallel>], iteration_bounds = array<i64: 1>, scalar_prefetch = 0 : i64, scratch_operands = 0 : i64, tpu.core_type = #tpu.core_type<tc>, window_params = [{transform_indices = @transform_0, window_bounds = array<i64: 16, 32>}, {pipeline_mode = #tpu.pipeline_mode<synchronous>, transform_indices = @transform_1, window_bounds = array<i64: 32, 128>}, {pipeline_mode = #tpu.pipeline_mode<synchronous>, transform_indices = @transform_2, window_bounds = array<i64: 5, 128, 128>}, {pipeline_mode = #tpu.pipeline_mode<synchronous>, transform_indices = @transform_3, window_bounds = array<i64: 16, 128>}, {transform_indices = @transform_4, window_bounds = array<i64: 16, 128>}]} {
    %c0 = arith.constant 0 : index
    %c0_0 = arith.constant 0 : index
    %0 = vector.load %arg1[%c0, %c0_0] : memref<16x32xf32, #tpu.memory_space<vmem>>, vector<16x32xf32>
    %1 = arith.truncf %0 : vector<16x32xf32> to vector<16x32xbf16>
    %c0_1 = arith.constant 0 : index
    %c0_2 = arith.constant 0 : index
    %2 = vector.load %arg2[%c0_1, %c0_2] : memref<32x128xbf16, #tpu.memory_space<vmem>>, vector<32x128xbf16>
    %cst = arith.constant dense<0.000000e+00> : vector<16x128xf32>
    %3 = tpu.matmul %1, %2, %cst {dimension_numbers = #tpu.dot_dimension_numbers<[1], [0], [0], [1], [0, 0, 1, 1], [], []>} : vector<16x32xbf16>, vector<32x128xbf16>, vector<16x128xf32> -> vector<16x128xf32>
    %c0_3 = arith.constant 0 : index
    %c0_4 = arith.constant 0 : index
    %4 = vector.load %arg4[%c0_3, %c0_4] : memref<16x128xf32, #tpu.memory_space<vmem>>, vector<1x128xf32>
    %5 = vector.shape_cast %4 : vector<1x128xf32> to vector<128xf32>
    %6 = vector.shape_cast %5 : vector<128xf32> to vector<1x128xf32>
    %7 = vector.broadcast %6 : vector<1x128xf32> to vector<16x128xf32>
    %8 = arith.addf %3, %7 : vector<16x128xf32>
    %cst_5 = arith.constant dense<0.000000e+00> : vector<16xf32>
    %9 = vector.multi_reduction <add>, %8, %cst_5 [1] : vector<16x128xf32> to vector<16xf32>
    %10 = vector.shape_cast %9 : vector<16xf32> to vector<16x1xf32>
    %11 = arith.mulf %8, %8 : vector<16x128xf32>
    %cst_6 = arith.constant dense<0.000000e+00> : vector<16xf32>
    %12 = vector.multi_reduction <add>, %11, %cst_6 [1] : vector<16x128xf32> to vector<16xf32>
    %13 = vector.shape_cast %12 : vector<16xf32> to vector<16x1xf32>
    %cst_7 = arith.constant 1.562500e-02 : f32
    %14 = vector.broadcast %cst_7 : f32 to vector<16x1xf32>
    %15 = arith.mulf %10, %14 : vector<16x1xf32>
    %cst_8 = arith.constant 1.562500e-02 : f32
    %16 = vector.broadcast %cst_8 : f32 to vector<16x1xf32>
    %17 = arith.mulf %13, %16 : vector<16x1xf32>
    %18 = arith.mulf %15, %15 : vector<16x1xf32>
    %19 = arith.subf %17, %18 : vector<16x1xf32>
    %cst_9 = arith.constant 9.99999974E-6 : f32
    %20 = vector.broadcast %cst_9 : f32 to vector<16x1xf32>
    %21 = arith.addf %19, %20 : vector<16x1xf32>
    %22 = math.rsqrt %21 : vector<16x1xf32>
    %c1 = arith.constant 1 : index
    %c0_10 = arith.constant 0 : index
    %23 = vector.load %arg4[%c1, %c0_10] : memref<16x128xf32, #tpu.memory_space<vmem>>, vector<1x128xf32>
    %24 = vector.shape_cast %23 : vector<1x128xf32> to vector<128xf32>
    %25 = vector.shape_cast %24 : vector<128xf32> to vector<1x128xf32>
    %26 = vector.broadcast %22 : vector<16x1xf32> to vector<16x128xf32>
    %27 = vector.broadcast %25 : vector<1x128xf32> to vector<16x128xf32>
    %28 = arith.mulf %26, %27 : vector<16x128xf32>
    %29 = vector.broadcast %15 : vector<16x1xf32> to vector<16x128xf32>
    %30 = arith.subf %8, %29 : vector<16x128xf32>
    %31 = arith.mulf %30, %28 : vector<16x128xf32>
    %c2 = arith.constant 2 : index
    %c0_11 = arith.constant 0 : index
    %32 = vector.load %arg4[%c2, %c0_11] : memref<16x128xf32, #tpu.memory_space<vmem>>, vector<1x128xf32>
    %33 = vector.shape_cast %32 : vector<1x128xf32> to vector<128xf32>
    %34 = vector.shape_cast %33 : vector<128xf32> to vector<1x128xf32>
    %35 = vector.broadcast %34 : vector<1x128xf32> to vector<16x128xf32>
    %36 = arith.addf %31, %35 : vector<16x128xf32>
    %cst_12 = arith.constant 0.000000e+00 : f32
    %37 = vector.broadcast %cst_12 : f32 to vector<16x128xf32>
    %38 = arith.maximumf %36, %37 : vector<16x128xf32>
    %39 = arith.truncf %38 : vector<16x128xf32> to vector<16x128xbf16>
    %c0_13 = arith.constant 0 : index
    %c0_14 = arith.constant 0 : index
    %c0_15 = arith.constant 0 : index
    %40 = vector.load %arg3[%c0_13, %c0_14, %c0_15] : memref<5x128x128xbf16, #tpu.memory_space<vmem>>, vector<1x128x128xbf16>
    %41 = vector.shape_cast %40 : vector<1x128x128xbf16> to vector<128x128xbf16>
    %cst_16 = arith.constant dense<0.000000e+00> : vector<16x128xf32>
    %42 = tpu.matmul %39, %41, %cst_16 {dimension_numbers = #tpu.dot_dimension_numbers<[1], [0], [0], [1], [0, 0, 1, 1], [], []>} : vector<16x128xbf16>, vector<128x128xbf16>, vector<16x128xf32> -> vector<16x128xf32>
    %c3 = arith.constant 3 : index
    %c0_17 = arith.constant 0 : index
    %43 = vector.load %arg4[%c3, %c0_17] : memref<16x128xf32, #tpu.memory_space<vmem>>, vector<1x128xf32>
    %44 = vector.shape_cast %43 : vector<1x128xf32> to vector<128xf32>
    %45 = vector.shape_cast %44 : vector<128xf32> to vector<1x128xf32>
    %46 = vector.broadcast %45 : vector<1x128xf32> to vector<16x128xf32>
    %47 = arith.addf %42, %46 : vector<16x128xf32>
    %cst_18 = arith.constant dense<0.000000e+00> : vector<16xf32>
    %48 = vector.multi_reduction <add>, %47, %cst_18 [1] : vector<16x128xf32> to vector<16xf32>
    %49 = vector.shape_cast %48 : vector<16xf32> to vector<16x1xf32>
    %50 = arith.mulf %47, %47 : vector<16x128xf32>
    %cst_19 = arith.constant dense<0.000000e+00> : vector<16xf32>
    %51 = vector.multi_reduction <add>, %50, %cst_19 [1] : vector<16x128xf32> to vector<16xf32>
    %52 = vector.shape_cast %51 : vector<16xf32> to vector<16x1xf32>
    %cst_20 = arith.constant 1.562500e-02 : f32
    %53 = vector.broadcast %cst_20 : f32 to vector<16x1xf32>
    %54 = arith.mulf %49, %53 : vector<16x1xf32>
    %cst_21 = arith.constant 1.562500e-02 : f32
    %55 = vector.broadcast %cst_21 : f32 to vector<16x1xf32>
    %56 = arith.mulf %52, %55 : vector<16x1xf32>
    %57 = arith.mulf %54, %54 : vector<16x1xf32>
    %58 = arith.subf %56, %57 : vector<16x1xf32>
    %cst_22 = arith.constant 9.99999974E-6 : f32
    %59 = vector.broadcast %cst_22 : f32 to vector<16x1xf32>
    %60 = arith.addf %58, %59 : vector<16x1xf32>
    %61 = math.rsqrt %60 : vector<16x1xf32>
    %c4 = arith.constant 4 : index
    %c0_23 = arith.constant 0 : index
    %62 = vector.load %arg4[%c4, %c0_23] : memref<16x128xf32, #tpu.memory_space<vmem>>, vector<1x128xf32>
    %63 = vector.shape_cast %62 : vector<1x128xf32> to vector<128xf32>
    %64 = vector.shape_cast %63 : vector<128xf32> to vector<1x128xf32>
    %65 = vector.broadcast %61 : vector<16x1xf32> to vector<16x128xf32>
    %66 = vector.broadcast %64 : vector<1x128xf32> to vector<16x128xf32>
    %67 = arith.mulf %65, %66 : vector<16x128xf32>
    %68 = vector.broadcast %54 : vector<16x1xf32> to vector<16x128xf32>
    %69 = arith.subf %47, %68 : vector<16x128xf32>
    %70 = arith.mulf %69, %67 : vector<16x128xf32>
    %c5 = arith.constant 5 : index
    %c0_24 = arith.constant 0 : index
    %71 = vector.load %arg4[%c5, %c0_24] : memref<16x128xf32, #tpu.memory_space<vmem>>, vector<1x128xf32>
    %72 = vector.shape_cast %71 : vector<1x128xf32> to vector<128xf32>
    %73 = vector.shape_cast %72 : vector<128xf32> to vector<1x128xf32>
    %74 = vector.broadcast %73 : vector<1x128xf32> to vector<16x128xf32>
    %75 = arith.addf %70, %74 : vector<16x128xf32>
    %cst_25 = arith.constant 0.000000e+00 : f32
    %76 = vector.broadcast %cst_25 : f32 to vector<16x128xf32>
    %77 = arith.maximumf %75, %76 : vector<16x128xf32>
    %78 = arith.truncf %77 : vector<16x128xf32> to vector<16x128xbf16>
    %c1_26 = arith.constant 1 : index
    %c0_27 = arith.constant 0 : index
    %c0_28 = arith.constant 0 : index
    %79 = vector.load %arg3[%c1_26, %c0_27, %c0_28] : memref<5x128x128xbf16, #tpu.memory_space<vmem>>, vector<1x128x128xbf16>
    %80 = vector.shape_cast %79 : vector<1x128x128xbf16> to vector<128x128xbf16>
    %cst_29 = arith.constant dense<0.000000e+00> : vector<16x128xf32>
    %81 = tpu.matmul %78, %80, %cst_29 {dimension_numbers = #tpu.dot_dimension_numbers<[1], [0], [0], [1], [0, 0, 1, 1], [], []>} : vector<16x128xbf16>, vector<128x128xbf16>, vector<16x128xf32> -> vector<16x128xf32>
    %c6 = arith.constant 6 : index
    %c0_30 = arith.constant 0 : index
    %82 = vector.load %arg4[%c6, %c0_30] : memref<16x128xf32, #tpu.memory_space<vmem>>, vector<1x128xf32>
    %83 = vector.shape_cast %82 : vector<1x128xf32> to vector<128xf32>
    %84 = vector.shape_cast %83 : vector<128xf32> to vector<1x128xf32>
    %85 = vector.broadcast %84 : vector<1x128xf32> to vector<16x128xf32>
    %86 = arith.addf %81, %85 : vector<16x128xf32>
    %cst_31 = arith.constant dense<0.000000e+00> : vector<16xf32>
    %87 = vector.multi_reduction <add>, %86, %cst_31 [1] : vector<16x128xf32> to vector<16xf32>
    %88 = vector.shape_cast %87 : vector<16xf32> to vector<16x1xf32>
    %89 = arith.mulf %86, %86 : vector<16x128xf32>
    %cst_32 = arith.constant dense<0.000000e+00> : vector<16xf32>
    %90 = vector.multi_reduction <add>, %89, %cst_32 [1] : vector<16x128xf32> to vector<16xf32>
    %91 = vector.shape_cast %90 : vector<16xf32> to vector<16x1xf32>
    %cst_33 = arith.constant 1.562500e-02 : f32
    %92 = vector.broadcast %cst_33 : f32 to vector<16x1xf32>
    %93 = arith.mulf %88, %92 : vector<16x1xf32>
    %cst_34 = arith.constant 1.562500e-02 : f32
    %94 = vector.broadcast %cst_34 : f32 to vector<16x1xf32>
    %95 = arith.mulf %91, %94 : vector<16x1xf32>
    %96 = arith.mulf %93, %93 : vector<16x1xf32>
    %97 = arith.subf %95, %96 : vector<16x1xf32>
    %cst_35 = arith.constant 9.99999974E-6 : f32
    %98 = vector.broadcast %cst_35 : f32 to vector<16x1xf32>
    %99 = arith.addf %97, %98 : vector<16x1xf32>
    %100 = math.rsqrt %99 : vector<16x1xf32>
    %c7 = arith.constant 7 : index
    %c0_36 = arith.constant 0 : index
    %101 = vector.load %arg4[%c7, %c0_36] : memref<16x128xf32, #tpu.memory_space<vmem>>, vector<1x128xf32>
    %102 = vector.shape_cast %101 : vector<1x128xf32> to vector<128xf32>
    %103 = vector.shape_cast %102 : vector<128xf32> to vector<1x128xf32>
    %104 = vector.broadcast %100 : vector<16x1xf32> to vector<16x128xf32>
    %105 = vector.broadcast %103 : vector<1x128xf32> to vector<16x128xf32>
    %106 = arith.mulf %104, %105 : vector<16x128xf32>
    %107 = vector.broadcast %93 : vector<16x1xf32> to vector<16x128xf32>
    %108 = arith.subf %86, %107 : vector<16x128xf32>
    %109 = arith.mulf %108, %106 : vector<16x128xf32>
    %c8 = arith.constant 8 : index
    %c0_37 = arith.constant 0 : index
    %110 = vector.load %arg4[%c8, %c0_37] : memref<16x128xf32, #tpu.memory_space<vmem>>, vector<1x128xf32>
    %111 = vector.shape_cast %110 : vector<1x128xf32> to vector<128xf32>
    %112 = vector.shape_cast %111 : vector<128xf32> to vector<1x128xf32>
    %113 = vector.broadcast %112 : vector<1x128xf32> to vector<16x128xf32>
    %114 = arith.addf %109, %113 : vector<16x128xf32>
    %cst_38 = arith.constant 0.000000e+00 : f32
    %115 = vector.broadcast %cst_38 : f32 to vector<16x128xf32>
    %116 = arith.maximumf %114, %115 : vector<16x128xf32>
    %117 = arith.truncf %116 : vector<16x128xf32> to vector<16x128xbf16>
    %c2_39 = arith.constant 2 : index
    %c0_40 = arith.constant 0 : index
    %c0_41 = arith.constant 0 : index
    %118 = vector.load %arg3[%c2_39, %c0_40, %c0_41] : memref<5x128x128xbf16, #tpu.memory_space<vmem>>, vector<1x128x128xbf16>
    %119 = vector.shape_cast %118 : vector<1x128x128xbf16> to vector<128x128xbf16>
    %cst_42 = arith.constant dense<0.000000e+00> : vector<16x128xf32>
    %120 = tpu.matmul %117, %119, %cst_42 {dimension_numbers = #tpu.dot_dimension_numbers<[1], [0], [0], [1], [0, 0, 1, 1], [], []>} : vector<16x128xbf16>, vector<128x128xbf16>, vector<16x128xf32> -> vector<16x128xf32>
    %c9 = arith.constant 9 : index
    %c0_43 = arith.constant 0 : index
    %121 = vector.load %arg4[%c9, %c0_43] : memref<16x128xf32, #tpu.memory_space<vmem>>, vector<1x128xf32>
    %122 = vector.shape_cast %121 : vector<1x128xf32> to vector<128xf32>
    %123 = vector.shape_cast %122 : vector<128xf32> to vector<1x128xf32>
    %124 = vector.broadcast %123 : vector<1x128xf32> to vector<16x128xf32>
    %125 = arith.addf %120, %124 : vector<16x128xf32>
    %cst_44 = arith.constant dense<0.000000e+00> : vector<16xf32>
    %126 = vector.multi_reduction <add>, %125, %cst_44 [1] : vector<16x128xf32> to vector<16xf32>
    %127 = vector.shape_cast %126 : vector<16xf32> to vector<16x1xf32>
    %128 = arith.mulf %125, %125 : vector<16x128xf32>
    %cst_45 = arith.constant dense<0.000000e+00> : vector<16xf32>
    %129 = vector.multi_reduction <add>, %128, %cst_45 [1] : vector<16x128xf32> to vector<16xf32>
    %130 = vector.shape_cast %129 : vector<16xf32> to vector<16x1xf32>
    %cst_46 = arith.constant 1.562500e-02 : f32
    %131 = vector.broadcast %cst_46 : f32 to vector<16x1xf32>
    %132 = arith.mulf %127, %131 : vector<16x1xf32>
    %cst_47 = arith.constant 1.562500e-02 : f32
    %133 = vector.broadcast %cst_47 : f32 to vector<16x1xf32>
    %134 = arith.mulf %130, %133 : vector<16x1xf32>
    %135 = arith.mulf %132, %132 : vector<16x1xf32>
    %136 = arith.subf %134, %135 : vector<16x1xf32>
    %cst_48 = arith.constant 9.99999974E-6 : f32
    %137 = vector.broadcast %cst_48 : f32 to vector<16x1xf32>
    %138 = arith.addf %136, %137 : vector<16x1xf32>
    %139 = math.rsqrt %138 : vector<16x1xf32>
    %c10 = arith.constant 10 : index
    %c0_49 = arith.constant 0 : index
    %140 = vector.load %arg4[%c10, %c0_49] : memref<16x128xf32, #tpu.memory_space<vmem>>, vector<1x128xf32>
    %141 = vector.shape_cast %140 : vector<1x128xf32> to vector<128xf32>
    %142 = vector.shape_cast %141 : vector<128xf32> to vector<1x128xf32>
    %143 = vector.broadcast %139 : vector<16x1xf32> to vector<16x128xf32>
    %144 = vector.broadcast %142 : vector<1x128xf32> to vector<16x128xf32>
    %145 = arith.mulf %143, %144 : vector<16x128xf32>
    %146 = vector.broadcast %132 : vector<16x1xf32> to vector<16x128xf32>
    %147 = arith.subf %125, %146 : vector<16x128xf32>
    %148 = arith.mulf %147, %145 : vector<16x128xf32>
    %c11 = arith.constant 11 : index
    %c0_50 = arith.constant 0 : index
    %149 = vector.load %arg4[%c11, %c0_50] : memref<16x128xf32, #tpu.memory_space<vmem>>, vector<1x128xf32>
    %150 = vector.shape_cast %149 : vector<1x128xf32> to vector<128xf32>
    %151 = vector.shape_cast %150 : vector<128xf32> to vector<1x128xf32>
    %152 = vector.broadcast %151 : vector<1x128xf32> to vector<16x128xf32>
    %153 = arith.addf %148, %152 : vector<16x128xf32>
    %cst_51 = arith.constant 0.000000e+00 : f32
    %154 = vector.broadcast %cst_51 : f32 to vector<16x128xf32>
    %155 = arith.maximumf %153, %154 : vector<16x128xf32>
    %156 = arith.truncf %155 : vector<16x128xf32> to vector<16x128xbf16>
    %c3_52 = arith.constant 3 : index
    %c0_53 = arith.constant 0 : index
    %c0_54 = arith.constant 0 : index
    %157 = vector.load %arg3[%c3_52, %c0_53, %c0_54] : memref<5x128x128xbf16, #tpu.memory_space<vmem>>, vector<1x128x128xbf16>
    %158 = vector.shape_cast %157 : vector<1x128x128xbf16> to vector<128x128xbf16>
    %cst_55 = arith.constant dense<0.000000e+00> : vector<16x128xf32>
    %159 = tpu.matmul %156, %158, %cst_55 {dimension_numbers = #tpu.dot_dimension_numbers<[1], [0], [0], [1], [0, 0, 1, 1], [], []>} : vector<16x128xbf16>, vector<128x128xbf16>, vector<16x128xf32> -> vector<16x128xf32>
    %c12 = arith.constant 12 : index
    %c0_56 = arith.constant 0 : index
    %160 = vector.load %arg4[%c12, %c0_56] : memref<16x128xf32, #tpu.memory_space<vmem>>, vector<1x128xf32>
    %161 = vector.shape_cast %160 : vector<1x128xf32> to vector<128xf32>
    %162 = vector.shape_cast %161 : vector<128xf32> to vector<1x128xf32>
    %163 = vector.broadcast %162 : vector<1x128xf32> to vector<16x128xf32>
    %164 = arith.addf %159, %163 : vector<16x128xf32>
    %cst_57 = arith.constant dense<0.000000e+00> : vector<16xf32>
    %165 = vector.multi_reduction <add>, %164, %cst_57 [1] : vector<16x128xf32> to vector<16xf32>
    %166 = vector.shape_cast %165 : vector<16xf32> to vector<16x1xf32>
    %167 = arith.mulf %164, %164 : vector<16x128xf32>
    %cst_58 = arith.constant dense<0.000000e+00> : vector<16xf32>
    %168 = vector.multi_reduction <add>, %167, %cst_58 [1] : vector<16x128xf32> to vector<16xf32>
    %169 = vector.shape_cast %168 : vector<16xf32> to vector<16x1xf32>
    %cst_59 = arith.constant 1.562500e-02 : f32
    %170 = vector.broadcast %cst_59 : f32 to vector<16x1xf32>
    %171 = arith.mulf %166, %170 : vector<16x1xf32>
    %cst_60 = arith.constant 1.562500e-02 : f32
    %172 = vector.broadcast %cst_60 : f32 to vector<16x1xf32>
    %173 = arith.mulf %169, %172 : vector<16x1xf32>
    %174 = arith.mulf %171, %171 : vector<16x1xf32>
    %175 = arith.subf %173, %174 : vector<16x1xf32>
    %cst_61 = arith.constant 9.99999974E-6 : f32
    %176 = vector.broadcast %cst_61 : f32 to vector<16x1xf32>
    %177 = arith.addf %175, %176 : vector<16x1xf32>
    %178 = math.rsqrt %177 : vector<16x1xf32>
    %c13 = arith.constant 13 : index
    %c0_62 = arith.constant 0 : index
    %179 = vector.load %arg4[%c13, %c0_62] : memref<16x128xf32, #tpu.memory_space<vmem>>, vector<1x128xf32>
    %180 = vector.shape_cast %179 : vector<1x128xf32> to vector<128xf32>
    %181 = vector.shape_cast %180 : vector<128xf32> to vector<1x128xf32>
    %182 = vector.broadcast %178 : vector<16x1xf32> to vector<16x128xf32>
    %183 = vector.broadcast %181 : vector<1x128xf32> to vector<16x128xf32>
    %184 = arith.mulf %182, %183 : vector<16x128xf32>
    %185 = vector.broadcast %171 : vector<16x1xf32> to vector<16x128xf32>
    %186 = arith.subf %164, %185 : vector<16x128xf32>
    %187 = arith.mulf %186, %184 : vector<16x128xf32>
    %c14 = arith.constant 14 : index
    %c0_63 = arith.constant 0 : index
    %188 = vector.load %arg4[%c14, %c0_63] : memref<16x128xf32, #tpu.memory_space<vmem>>, vector<1x128xf32>
    %189 = vector.shape_cast %188 : vector<1x128xf32> to vector<128xf32>
    %190 = vector.shape_cast %189 : vector<128xf32> to vector<1x128xf32>
    %191 = vector.broadcast %190 : vector<1x128xf32> to vector<16x128xf32>
    %192 = arith.addf %187, %191 : vector<16x128xf32>
    %cst_64 = arith.constant 0.000000e+00 : f32
    %193 = vector.broadcast %cst_64 : f32 to vector<16x128xf32>
    %194 = arith.maximumf %192, %193 : vector<16x128xf32>
    %195 = arith.truncf %194 : vector<16x128xf32> to vector<16x128xbf16>
    %c4_65 = arith.constant 4 : index
    %c0_66 = arith.constant 0 : index
    %c0_67 = arith.constant 0 : index
    %196 = vector.load %arg3[%c4_65, %c0_66, %c0_67] : memref<5x128x128xbf16, #tpu.memory_space<vmem>>, vector<1x128x128xbf16>
    %197 = vector.shape_cast %196 : vector<1x128x128xbf16> to vector<128x128xbf16>
    %cst_68 = arith.constant dense<0.000000e+00> : vector<16x128xf32>
    %198 = tpu.matmul %195, %197, %cst_68 {dimension_numbers = #tpu.dot_dimension_numbers<[1], [0], [0], [1], [0, 0, 1, 1], [], []>} : vector<16x128xbf16>, vector<128x128xbf16>, vector<16x128xf32> -> vector<16x128xf32>
    %c15 = arith.constant 15 : index
    %c0_69 = arith.constant 0 : index
    %199 = vector.load %arg4[%c15, %c0_69] : memref<16x128xf32, #tpu.memory_space<vmem>>, vector<1x128xf32>
    %200 = vector.shape_cast %199 : vector<1x128xf32> to vector<128xf32>
    %201 = vector.shape_cast %200 : vector<128xf32> to vector<1x128xf32>
    %202 = vector.broadcast %201 : vector<1x128xf32> to vector<16x128xf32>
    %203 = arith.addf %198, %202 : vector<16x128xf32>
    %204 = math.tanh %203 : vector<16x128xf32>
    %c0_70 = arith.constant 0 : index
    %c0_71 = arith.constant 0 : index
    %205 = vector.load %arg5[%c0_70, %c0_71] : memref<16x128xf32, #tpu.memory_space<vmem>>, vector<16x128xf32>
    tpu.vector_store %arg5[%c0_70, %c0_71], %204 {strides = array<i32>} : memref<16x128xf32, #tpu.memory_space<vmem>>, vector<16x128xf32>,
    return
  }
  func.func @transform_0(%arg0: i32) -> (i32, i32) {
    %c0_i32 = arith.constant 0 : i32
    %c0_i32_0 = arith.constant 0 : i32
    return %arg0, %c0_i32 : i32, i32
  }
  func.func @transform_1(%arg0: i32) -> (i32, i32) {
    %c0_i32 = arith.constant 0 : i32
    %c0_i32_0 = arith.constant 0 : i32
    %c0_i32_1 = arith.constant 0 : i32
    return %c0_i32, %c0_i32_0 : i32, i32
  }
  func.func @transform_2(%arg0: i32) -> (i32, i32, i32) {
    %c0_i32 = arith.constant 0 : i32
    %c0_i32_0 = arith.constant 0 : i32
    %c0_i32_1 = arith.constant 0 : i32
    %c0_i32_2 = arith.constant 0 : i32
    return %c0_i32, %c0_i32_0, %c0_i32_1 : i32, i32, i32
  }
  func.func @transform_3(%arg0: i32) -> (i32, i32) {
    %c0_i32 = arith.constant 0 : i32
    %c0_i32_0 = arith.constant 0 : i32
    %c0_i32_1 = arith.constant 0 : i32
    return %c0_i32, %c0_i32_0 : i32, i32
  }
  func.func @transform_4(%arg0: i32) -> (i32, i32) {
    %c0_i32 = arith.constant 0 : i32
    %c0_i32_0 = arith.constant 0 : i32
    return %arg0, %c0_i32 : i32, i32
  }
}

</mosaic_0001>

<bundles_post_ra>
// kernel: tpu_custom_call.1
= control target key start
LH: loop header
LB: loop body
LE: loop exit
PB: predicated region body
PF: predicated region fallthrough
CT: control target
= control target key end

     0   :  { %9 = vsyncpa [#allocation3], 0  ;;  %s1517_s0 = inlined_call_operand.hbm [shape: f32[16,32], index: 0, kind: input, shape index: {}]   ;;  %s1518_s1 = inlined_call_operand.hbm [shape: bf16[32,128], index: 1, kind: input, shape index: {}]   ;;  %s1519_s2 = inlined_call_operand.hbm [shape: bf16[5,128,128], index: 2, kind: input, shape index: {}]   ;;  %s1520_s3 = inlined_call_operand.hbm [shape: f32[16,128], index: 3, kind: input, shape index: {}]   ;;  %s1521_s4 = inlined_call_operand.hbm [shape: f32[16,128], index: 4, kind: output, shape index: {}]  }
   0x1   :  { %10 = vsyncpa [#allocation6], 0 }
   0x2   :  { %11 = vsyncpa [#allocation9], 0 }
   0x3   :  { %12 = vsyncpa [#allocation4], 0  ;;  %s1345_s15 = smov [#allocation5]   ;;  %s1227_s19 = scalar_lea.hbm %s1518_s1, 256 }
   0x4   :  { %s30_s16 = sshll.u32 %s1345_s15, 4  ;;  %p1228_p0 = scmp.ne.s32.totalorder %s1518_s1, %s1227_s19  ;;  %s31_s16 = int_to_ptr.vmem [resolvable:$true] %s30_s16 }
   0x5   :  { %p1231_p1 = scmp.lt.u32.totalorder %s1227_s19, %s1518_s1 }
   0x7   :  { %p1233_p2 = pnand %p1231_p1, %p1228_p0 }
   0x9   :  { %1236 = shalt.err (!%p1233_p2)
}
   0xa   :  { %s1237_s24 = scalar_lea.vmem %s31_s16, 256  ;;  %p1242_p4 = scmp.lt.s32.totalorder %s31_s16, %s31_s16 }
   0xb   :  { %p1238_p3 = scmp.ne.s32.totalorder %s31_s16, %s1237_s24  ;;  %p1243_p5 = scmp.lt.s32.totalorder %s1237_s24, %s1237_s24 }
   0xd   :  { %p1244_p6 = por %p1243_p5, %p1242_p4 }
   0xf   :  { %p1245_p7 = pnand %p1244_p6, %p1238_p3 }
  0x11   :  { %1248 = shalt.err (!%p1245_p7)
}
  0x12   :  { %s1346_s25 = smov 64   ;;  %s1347_s26 = smov 4  }
  0x13   :  { %36 = dma.hbm_to_vmem [thread:$0]  %s1518_s1, 256, %s31_s16, [#allocation6], %s1346_s25, %s1346_s25, %s1347_s26  }
  0x14   :  { %s1348_s29 = smov [#allocation2]   ;;  %s1249_s7 = scalar_lea.hbm %s1517_s0, 256 }
  0x15   :  { %s18_s30 = sshll.u32 %s1348_s29, 4  ;;  %p1250_p8 = scmp.ne.s32.totalorder %s1517_s0, %s1249_s7  ;;  %s19_s30 = int_to_ptr.vmem [resolvable:$true] %s18_s30 }
  0x16   :  { %p1253_p9 = scmp.lt.u32.totalorder %s1249_s7, %s1517_s0 }
  0x18   :  { %p1255_p10 = pnand %p1253_p9, %p1250_p8 }
  0x1a   :  { %1258 = shalt.err (!%p1255_p10)
}
  0x1b   :  { %s1259_s12 = scalar_lea.vmem %s19_s30, 256  ;;  %p1264_p12 = scmp.lt.s32.totalorder %s19_s30, %s19_s30 }
  0x1c   :  { %p1260_p11 = scmp.ne.s32.totalorder %s19_s30, %s1259_s12  ;;  %p1265_p13 = scmp.lt.s32.totalorder %s1259_s12, %s1259_s12 }
  0x1e   :  { %p1266_p0 = por %p1265_p13, %p1264_p12 }
  0x20   :  { %p1267_p1 = pnand %p1266_p0, %p1260_p11 }
  0x22   :  { %1270 = shalt.err (!%p1267_p1)
}
  0x23   :  { %s1349_s1 = smov 128   ;;  %s1350_s13 = smov 8  }
  0x24   :  { %24 = dma.hbm_to_vmem [thread:$0]  %s1517_s0, 256, %s19_s30, [#allocation3], %s1349_s1, %s1349_s1, %s1350_s13  }
  0x25   :  { %s1351_s16 = smov [#allocation7]   ;;  %s1352_s18 = smov [#allocation8]  }
  0x26   :  { %s42_s17 = sshll.u32 %s1351_s16, 4  ;;  %s54_s19 = sshll.u32 %s1352_s18, 4  ;;  %s43_s17 = int_to_ptr.vmem [resolvable:$true] %s42_s17  ;;  %s1411_s19 = int_to_ptr.vmem [resolvable:$true] %s54_s19 }
  0x27   :  { %s1271_s22 = scalar_lea.hbm %s1519_s2, 5120 }
  0x28   :  { %p1272_p2 = scmp.ne.s32.totalorder %s1519_s2, %s1271_s22  ;;  %p1275_p3 = scmp.lt.u32.totalorder %s1271_s22, %s1519_s2 }
  0x2a   :  { %p1277_p4 = pnand %p1275_p3, %p1272_p2 }
  0x2c   :  { %1280 = shalt.err (!%p1277_p4)
}
  0x2d   :  { %s1281_s0 = scalar_lea.vmem %s43_s17, 5120  ;;  %p1286_p6 = scmp.lt.s32.totalorder %s43_s17, %s43_s17 }
  0x2e   :  { %p1282_p5 = scmp.ne.s32.totalorder %s43_s17, %s1281_s0  ;;  %p1287_p7 = scmp.lt.s32.totalorder %s1281_s0, %s1281_s0 }
  0x30   :  { %p1288_p8 = por %p1287_p7, %p1286_p6 }
  0x32   :  { %p1289_p9 = pnand %p1288_p8, %p1282_p5 }
  0x34   :  { %1292 = shalt.err (!%p1289_p9)
}
  0x35   :  { %48 = dma.hbm_to_vmem [thread:$0]  %s1519_s2, 5120, %s43_s17, [#allocation6], %s1346_s25, %s1346_s25, %s1347_s26  }
  0x36   :  { %s1293_s7 = scalar_lea.hbm %s1520_s3, 256 }
  0x37   :  { %p1294_p10 = scmp.ne.s32.totalorder %s1520_s3, %s1293_s7  ;;  %p1297_p11 = scmp.lt.u32.totalorder %s1293_s7, %s1520_s3 }
  0x39   :  { %p1299_p12 = pnand %p1297_p11, %p1294_p10 }
  0x3b   :  { %1302 = shalt.err (!%p1299_p12)
}
  0x3c   :  { %s1303_s12 = scalar_lea.vmem %s1411_s19, 256  ;;  %p1308_p0 = scmp.lt.s32.totalorder %s1411_s19, %s1411_s19 }
  0x3d   :  { %p1304_p13 = scmp.ne.s32.totalorder %s1411_s19, %s1303_s12  ;;  %p1309_p1 = scmp.lt.s32.totalorder %s1303_s12, %s1303_s12 }
  0x3f   :  { %p1310_p2 = por %p1309_p1, %p1308_p0 }
  0x41   :  { %p1311_p3 = pnand %p1310_p2, %p1304_p13 }
  0x43   :  { %1314 = shalt.err (!%p1311_p3)
}
  0x44   :  { %60 = dma.hbm_to_vmem [thread:$0]  %s1520_s3, 256, %s1411_s19, [#allocation9], %s1349_s1, %s1349_s1, %s1350_s13  }
  0x45   :  { %1337 = dma.done.wait [#allocation3], 256  }
  0x46   :  { %1338 = vsyncadd [#allocation3], 4294967040 }
  0x47   :  { %1339 = dma.done.wait [#allocation6], 5376  }
  0x48   :  { %1340 = vsyncadd [#allocation6], 4294961920 }
  0x49   :  { %1341 = dma.done.wait [#allocation9], 256  }
  0x4a   :  { %1342 = vsyncadd [#allocation9], 4294967040  ;;  %v1353_v0 = vmov 0.0   ;;  %vm1354_vm0 = vmmov 0   ;;  %v1161_v1 = vld [vmem:[#allocation5] sm:$0xff]   ;;  %v1162_v2 = vld [vmem:[#allocation5 + $0x8] sm:$0xff]  }
  0x4b   :  { %1042 = vmatprep.subr.bf16.mxu0 %v1353_v0  ;;  %1046 = vmatprep.mubr.msk.bf16.mxu0 %vm1354_vm0, %v1353_v0  ;;  %v74_v3 = vld [vmem:[#allocation2] sm:$0xff]  ;;  %v75_v4 = vld [vmem:[#allocation2 + $0x8] sm:$0xff]  ;;  %vm98_vm1 = vcmask 261120   ;;  %v1165_v17 = vld [vmem:[#allocation7 + $0x10] sm:$0xff]   ;;  %s1355_s3 = smov [#allocation10]  }
  0x4c   :  { %1050 = vmatprep.subr.bf16.mxu1 %v1353_v0  ;;  %1066 = vmatprep.mubr.msk.bf16.mxu1 %vm1354_vm0, %v1353_v0  ;;  %v76_v5 = vpack.c.bf16 %v75_v4, %v74_v3  ;;  %v935_v6 = vld [vmem:[#allocation8] ss:$0 sm:$0xff]  ;;  %v1164_v16 = vld [vmem:[#allocation7 + $0x8] sm:$0xff]   ;;  %v1166_v18 = vld [vmem:[#allocation7 + $0x18] sm:$0xff]   ;;  %s921_s26 = sshll.u32 %s1355_s3, 4  ;;  %s922_s26 = int_to_ptr.vmem [resolvable:$true] %s921_s26 }
  0x4d   :  { %1043 = vmatpush3.bf16.msra.mxu0 %v1161_v1  ;;  %v1163_v15 = vld [vmem:[#allocation7] sm:$0xff]   ;;  %v1168_v20 = vld [vmem:[#allocation7 + $0x28] sm:$0xff]   ;;  %v1169_v21 = vld [vmem:[#allocation7 + $0x30] sm:$0xff]   ;;  %s1315_s14 = scalar_lea.vmem %s922_s26, 256  ;;  %p1320_p5 = scmp.lt.s32.totalorder %s922_s26, %s922_s26 }
  0x4e   :  { %1044 = vmatprep.subr.bf16.mxu0 %v1353_v0  ;;  %1051 = vmatpush3.bf16.msra.mxu1 %v1163_v15  ;;  %v1167_v19 = vld [vmem:[#allocation7 + $0x20] sm:$0xff]   ;;  %v1170_v22 = vld [vmem:[#allocation7 + $0x38] sm:$0xff]   ;;  %v1172_v62 = vld [vmem:[#allocation7 + $0x48] sm:$0xff]   ;;  %p1316_p4 = scmp.ne.s32.totalorder %s922_s26, %s1315_s14  ;;  %p1321_p6 = scmp.lt.s32.totalorder %s1315_s14, %s1315_s14 }
  0x4f   :  { %1052 = vmatprep.subr.bf16.mxu1 %v1353_v0  ;;  %v939_v37 = vld [vmem:[#allocation8 + $0x1] ss:$0 sm:$0xff]  ;;  %v940_v43 = vld [vmem:[#allocation8 + $0x2] ss:$0 sm:$0xff]  ;;  %v941_v52 = vld [vmem:[#allocation8 + $0x3] ss:$0 sm:$0xff] }
  0x50   :  { %v1171_v61 = vld [vmem:[#allocation7 + $0x40] sm:$0xff]   ;;  %v1173_v63 = vld [vmem:[#allocation7 + $0x50] sm:$0xff]   ;;  %v1174_v1 = vld [vmem:[#allocation7 + $0x58] sm:$0xff]   ;;  %p1322_p7 = por %p1321_p6, %p1320_p5 }
  0x51   :  { %1045 = vmatpush3.bf16.msra.mxu0 %v1162_v2  ;;  %v1175_v2 = vld [vmem:[#allocation7 + $0x60] sm:$0xff]   ;;  %v1176_v3 = vld [vmem:[#allocation7 + $0x68] sm:$0xff]   ;;  %v1177_v4 = vld [vmem:[#allocation7 + $0x70] sm:$0xff]  }
  0x52   :  { %1070 = vmatprep.subr.bf16.mxu0 %v1353_v0  ;;  %1053 = vmatpush3.bf16.msra.mxu1 %v1164_v16  ;;  %p1323_p8 = pnand %p1322_p7, %p1316_p4 }
  0x53   :  { %1054 = vmatprep.subr.bf16.mxu1 %v1353_v0 }
  0x54   :  { %1047 = vmatmul.mubr.msk.bf16.vlgmr.msra.gmra.mrb[0].mxu0 %vm98_vm1, %v76_v5  ;;  %v1178_v5 = vld [vmem:[#allocation7 + $0x78] sm:$0xff]  }
  0x55   :  { %1086 = vmatprep.mubr.msk.bf16.mxu0 %vm1354_vm0, %v1353_v0  ;;  %1071 = vmatpush3.bf16.msra.mxu0 %v1171_v61 }
  0x56   :  { %1055 = vmatpush3.bf16.msra.mxu1 %v1165_v17  ;;  %1072 = vmatprep.subr.bf16.mxu0 %v1353_v0 }
  0x57   :  { %1056 = vmatprep.subr.bf16.mxu1 %v1353_v0 }
  0x59   :  { %1073 = vmatpush3.bf16.msra.mxu0 %v1172_v62 }
  0x5a   :  { %1057 = vmatpush3.bf16.msra.mxu1 %v1166_v18  ;;  %1074 = vmatprep.subr.bf16.mxu0 %v1353_v0 }
  0x5b   :  { %1058 = vmatprep.subr.bf16.mxu1 %v1353_v0 }
  0x5d   :  { %1075 = vmatpush3.bf16.msra.mxu0 %v1173_v63 }
  0x5e   :  { %1059 = vmatpush3.bf16.msra.mxu1 %v1167_v19  ;;  %1076 = vmatprep.subr.bf16.mxu0 %v1353_v0 }
  0x5f   :  { %1060 = vmatprep.subr.bf16.mxu1 %v1353_v0 }
  0x61   :  { %1077 = vmatpush3.bf16.msra.mxu0 %v1174_v1 }
  0x62   :  { %1061 = vmatpush3.bf16.msra.mxu1 %v1168_v20  ;;  %1078 = vmatprep.subr.bf16.mxu0 %v1353_v0  ;;  %v950_v20 = vld [vmem:[#allocation8 + $0x4] ss:$0 sm:$0xff] }
  0x63   :  { %1062 = vmatprep.subr.bf16.mxu1 %v1353_v0 }
  0x65   :  { %1079 = vmatpush3.bf16.msra.mxu0 %v1175_v2 }
  0x66   :  { %1063 = vmatpush3.bf16.msra.mxu1 %v1169_v21  ;;  %1080 = vmatprep.subr.bf16.mxu0 %v1353_v0 }
  0x67   :  { %1064 = vmatprep.subr.bf16.mxu1 %v1353_v0 }
  0x69   :  { %1081 = vmatpush3.bf16.msra.mxu0 %v1176_v3  ;;  %v961_v3 = vld [vmem:[#allocation8 + $0x7] ss:$0 sm:$0xff] }
  0x6a   :  { %1065 = vmatpush3.bf16.msra.mxu1 %v1170_v22  ;;  %1082 = vmatprep.subr.bf16.mxu0 %v1353_v0 }
  0x6b   :  { %1090 = vmatprep.subr.bf16.mxu1 %v1353_v0 }
  0x6d   :  { %1083 = vmatpush3.bf16.msra.mxu0 %v1177_v4 }
  0x6e   :  { %1084 = vmatprep.subr.bf16.mxu0 %v1353_v0 }
  0x71   :  { %1085 = vmatpush3.bf16.msra.mxu0 %v1178_v5 }
  0x72   :  { %1110 = vmatprep.subr.bf16.mxu0 %v1353_v0 }
 0x127   :  { %v136_v7 = vpop.f32.mrb[0].mxu0 }
 0x128   :  { %v137_v8 = vadd.f32 %v935_v6, %v136_v7  ;;  %v1048_v9 = vpop.f32.mrb[1].mxu0 }
 0x129   :  { %v139_v10 = vpop.f32.mrb[2].mxu0 }
 0x12a   :  { %v140_v11 = vadd.f32 %v935_v6, %v139_v10  ;;  %143 = vadd.xlane.f32.xlu0 %v137_v8  ;;  %v1049_v12 = vpop.f32.mrb[3].mxu0  ;;  %v147_v13 = vmul.f32 %v137_v8, %v137_v8 }
 0x12c   :  { %149 = vadd.xlane.f32.xlu1 %v147_v13  ;;  %v148_v14 = vmul.f32 %v140_v11, %v140_v11 }
 0x12e   :  { %145 = vadd.xlane.f32.xlu0 %v140_v11 }
 0x130   :  { %151 = vadd.xlane.f32.xlu1 %v148_v14 }
 0x1b7   :  { %v144_v23 = vpop.xlane.xlu0 %143 }
 0x1b8   :  { %v153_v24 = vmul.f32 0.015625, %v144_v23 }
 0x1b9   :  { %v150_v25 = vpop.xlane.xlu1 %149 }
 0x1ba   :  { %v157_v26 = vmul.f32 %v153_v24, %v153_v24  ;;  %v155_v27 = vmul.f32 0.015625, %v150_v25  ;;  %v172_v39 = vsub.f32 %v137_v8, %v153_v24  ;;  %v951_v25 = vld [vmem:[#allocation8 + $0x5] ss:$0 sm:$0xff] }
 0x1bb   :  { %v146_v28 = vpop.xlane.xlu0 %145 }
 0x1bc   :  { %v159_v29 = vsub.f32 %v155_v27, %v157_v26  ;;  %v154_v30 = vmul.f32 0.015625, %v146_v28 }
 0x1bd   :  { %v152_v31 = vpop.xlane.xlu1 %151 }
 0x1be   :  { %v161_v32 = vadd.f32 1e-05, %v159_v29  ;;  %v158_v33 = vmul.f32 %v154_v30, %v154_v30  ;;  %v156_v34 = vmul.f32 0.015625, %v152_v31  ;;  %v173_v44 = vsub.f32 %v140_v11, %v154_v30 }
 0x1c0   :  { %1203 = vrsqrt.f32 %v161_v32  ;;  %v160_v35 = vsub.f32 %v156_v34, %v158_v33 }
 0x1c2   :  { %v162_v36 = vadd.f32 1e-05, %v160_v35  ;;  %v952_v35 = vld [vmem:[#allocation8 + $0x6] ss:$0 sm:$0xff] }
 0x1c4   :  { %1205 = vrsqrt.f32 %v162_v36 }
 0x1ca   :  { %v1204_v38 = vpop.eup %1203 }
 0x1cb   :  { %v170_v40 = vmul.f32 %v1204_v38, %v939_v37 }
 0x1cd   :  { %v174_v41 = vmul.f32 %v172_v39, %v170_v40 }
 0x1ce   :  { %v1206_v42 = vpop.eup %1205 }
 0x1cf   :  { %v171_v45 = vmul.f32 %v1206_v42, %v939_v37  ;;  %v181_v47 = vadd.f32 %v940_v43, %v174_v41 }
 0x1d1   :  { %v175_v46 = vmul.f32 %v173_v44, %v171_v45  ;;  %v183_v49 = vmax.f32 %v181_v47, 0.0  ;;  %v1179_v44 = vld [vmem:[#allocation7 + $0x80] sm:$0xff]   ;;  %v1180_v45 = vld [vmem:[#allocation7 + $0x88] sm:$0xff]   ;;  %v1182_v47 = vld [vmem:[#allocation7 + $0x98] sm:$0xff]  }
 0x1d3   :  { %v182_v48 = vadd.f32 %v940_v43, %v175_v46  ;;  %v1181_v46 = vld [vmem:[#allocation7 + $0x90] sm:$0xff]  }
 0x1d5   :  { %v184_v50 = vmax.f32 %v182_v48, 0.0  ;;  %v1183_v48 = vld [vmem:[#allocation7 + $0xa0] sm:$0xff]  }
 0x1d7   :  { %v185_v51 = vpack.c.bf16 %v184_v50, %v183_v49  ;;  %v1184_v49 = vld [vmem:[#allocation7 + $0xa8] sm:$0xff]   ;;  %v1185_v50 = vld [vmem:[#allocation7 + $0xb0] sm:$0xff]  }
 0x1d9   :  { %1067 = vmatmul.mubr.bf16.vlgmr.msra.gmra.mrb[0].mxu1 %v185_v51  ;;  %v1186_v51 = vld [vmem:[#allocation7 + $0xb8] sm:$0xff]  }
 0x1da   :  { %1106 = vmatprep.mubr.msk.bf16.mxu1 %vm1354_vm0, %v1353_v0  ;;  %1091 = vmatpush3.bf16.msra.mxu1 %v1179_v44 }
 0x1db   :  { %1092 = vmatprep.subr.bf16.mxu1 %v1353_v0 }
 0x1de   :  { %1093 = vmatpush3.bf16.msra.mxu1 %v1180_v45 }
 0x1df   :  { %1094 = vmatprep.subr.bf16.mxu1 %v1353_v0 }
 0x1e2   :  { %1095 = vmatpush3.bf16.msra.mxu1 %v1181_v46 }
 0x1e3   :  { %1096 = vmatprep.subr.bf16.mxu1 %v1353_v0 }
 0x1e6   :  { %1097 = vmatpush3.bf16.msra.mxu1 %v1182_v47 }
 0x1e7   :  { %1098 = vmatprep.subr.bf16.mxu1 %v1353_v0 }
 0x1ea   :  { %1099 = vmatpush3.bf16.msra.mxu1 %v1183_v48 }
 0x1eb   :  { %1100 = vmatprep.subr.bf16.mxu1 %v1353_v0 }
 0x1ee   :  { %1101 = vmatpush3.bf16.msra.mxu1 %v1184_v49  ;;  %v972_v49 = vld [vmem:[#allocation8 + $0xa] ss:$0 sm:$0xff] }
 0x1ef   :  { %1102 = vmatprep.subr.bf16.mxu1 %v1353_v0 }
 0x1f2   :  { %1103 = vmatpush3.bf16.msra.mxu1 %v1185_v50 }
 0x1f3   :  { %1104 = vmatprep.subr.bf16.mxu1 %v1353_v0 }
 0x1f6   :  { %1105 = vmatpush3.bf16.msra.mxu1 %v1186_v51 }
 0x1f7   :  { %1130 = vmatprep.subr.bf16.mxu1 %v1353_v0 }
 0x2ac   :  { %v289_v53 = vpop.f32.mrb[0].mxu1 }
 0x2ad   :  { %v290_v54 = vadd.f32 %v941_v52, %v289_v53  ;;  %v1068_v55 = vpop.f32.mrb[1].mxu1 }
 0x2ae   :  { %v292_v56 = vpop.f32.mrb[2].mxu1 }
 0x2af   :  { %v293_v57 = vadd.f32 %v941_v52, %v292_v56  ;;  %296 = vadd.xlane.f32.xlu0 %v290_v54  ;;  %v1069_v58 = vpop.f32.mrb[3].mxu1  ;;  %v300_v59 = vmul.f32 %v290_v54, %v290_v54 }
 0x2b1   :  { %298 = vadd.xlane.f32.xlu1 %v293_v57  ;;  %v301_v60 = vmul.f32 %v293_v57, %v293_v57 }
 0x2b3   :  { %302 = vadd.xlane.f32.xlu0 %v300_v59 }
 0x2b5   :  { %304 = vadd.xlane.f32.xlu1 %v301_v60 }
 0x33c   :  { %v297_v6 = vpop.xlane.xlu0 %296 }
 0x33d   :  { %v306_v7 = vmul.f32 0.015625, %v297_v6 }
 0x33e   :  { %v299_v8 = vpop.xlane.xlu1 %298 }
 0x33f   :  { %v307_v9 = vmul.f32 0.015625, %v299_v8  ;;  %v310_v11 = vmul.f32 %v306_v7, %v306_v7  ;;  %v325_v22 = vsub.f32 %v290_v54, %v306_v7  ;;  %v962_v8 = vld [vmem:[#allocation8 + $0x8] ss:$0 sm:$0xff] }
 0x340   :  { %v303_v10 = vpop.xlane.xlu0 %302 }
 0x341   :  { %v308_v12 = vmul.f32 0.015625, %v303_v10  ;;  %v311_v14 = vmul.f32 %v307_v9, %v307_v9  ;;  %v326_v26 = vsub.f32 %v293_v57, %v307_v9 }
 0x342   :  { %v305_v13 = vpop.xlane.xlu1 %304 }
 0x343   :  { %v312_v15 = vsub.f32 %v308_v12, %v310_v11  ;;  %v309_v16 = vmul.f32 0.015625, %v305_v13 }
 0x345   :  { %v314_v17 = vadd.f32 1e-05, %v312_v15  ;;  %v313_v18 = vsub.f32 %v309_v16, %v311_v14 }
 0x347   :  { %1207 = vrsqrt.f32 %v314_v17  ;;  %v315_v19 = vadd.f32 1e-05, %v313_v18  ;;  %v963_v18 = vld [vmem:[#allocation8 + $0x9] ss:$0 sm:$0xff] }
 0x349   :  { %1209 = vrsqrt.f32 %v315_v19 }
 0x351   :  { %v1208_v21 = vpop.eup %1207 }
 0x352   :  { %v323_v23 = vmul.f32 %v1208_v21, %v950_v20 }
 0x353   :  { %v1210_v24 = vpop.eup %1209 }
 0x354   :  { %v324_v27 = vmul.f32 %v1210_v24, %v950_v20  ;;  %v327_v28 = vmul.f32 %v325_v22, %v323_v23 }
 0x356   :  { %v328_v29 = vmul.f32 %v326_v26, %v324_v27  ;;  %v334_v30 = vadd.f32 %v951_v25, %v327_v28  ;;  %v1187_v27 = vld [vmem:[#allocation7 + $0xc0] sm:$0xff]   ;;  %v1188_v28 = vld [vmem:[#allocation7 + $0xc8] sm:$0xff]  }
 0x358   :  { %v335_v31 = vadd.f32 %v951_v25, %v328_v29  ;;  %v336_v32 = vmax.f32 %v334_v30, 0.0  ;;  %v1189_v29 = vld [vmem:[#allocation7 + $0xd0] sm:$0xff]   ;;  %v1190_v30 = vld [vmem:[#allocation7 + $0xd8] sm:$0xff]  }
 0x35a   :  { %v337_v33 = vmax.f32 %v335_v31, 0.0  ;;  %v1191_v31 = vld [vmem:[#allocation7 + $0xe0] sm:$0xff]  }
 0x35c   :  { %v338_v34 = vpack.c.bf16 %v337_v33, %v336_v32  ;;  %v1192_v32 = vld [vmem:[#allocation7 + $0xe8] sm:$0xff]   ;;  %v1193_v33 = vld [vmem:[#allocation7 + $0xf0] sm:$0xff]  }
 0x35e   :  { %1087 = vmatmul.mubr.bf16.vlgmr.msra.gmra.mrb[4].mxu0 %v338_v34  ;;  %v1194_v34 = vld [vmem:[#allocation7 + $0xf8] sm:$0xff]  }
 0x35f   :  { %1126 = vmatprep.mubr.msk.bf16.mxu0 %vm1354_vm0, %v1353_v0  ;;  %1111 = vmatpush3.bf16.msra.mxu0 %v1187_v27 }
 0x360   :  { %1112 = vmatprep.subr.bf16.mxu0 %v1353_v0 }
 0x363   :  { %1113 = vmatpush3.bf16.msra.mxu0 %v1188_v28 }
 0x364   :  { %1114 = vmatprep.subr.bf16.mxu0 %v1353_v0 }
 0x367   :  { %1115 = vmatpush3.bf16.msra.mxu0 %v1189_v29 }
 0x368   :  { %1116 = vmatprep.subr.bf16.mxu0 %v1353_v0 }
 0x36b   :  { %1117 = vmatpush3.bf16.msra.mxu0 %v1190_v30 }
 0x36c   :  { %1118 = vmatprep.subr.bf16.mxu0 %v1353_v0 }
 0x36f   :  { %1119 = vmatpush3.bf16.msra.mxu0 %v1191_v31 }
 0x370   :  { %1120 = vmatprep.subr.bf16.mxu0 %v1353_v0 }
 0x373   :  { %1121 = vmatpush3.bf16.msra.mxu0 %v1192_v32  ;;  %v983_v32 = vld [vmem:[#allocation8 + $0xd] ss:$0 sm:$0xff] }
 0x374   :  { %1122 = vmatprep.subr.bf16.mxu0 %v1353_v0 }
 0x377   :  { %1123 = vmatpush3.bf16.msra.mxu0 %v1193_v33 }
 0x378   :  { %1124 = vmatprep.subr.bf16.mxu0 %v1353_v0 }
 0x37b   :  { %1125 = vmatpush3.bf16.msra.mxu0 %v1194_v34 }
 0x431   :  { %v443_v36 = vpop.f32.mrb[4].mxu0 }
 0x432   :  { %v444_v37 = vadd.f32 %v952_v35, %v443_v36  ;;  %v1088_v38 = vpop.f32.mrb[5].mxu0 }
 0x433   :  { %v446_v39 = vpop.f32.mrb[6].mxu0 }
 0x434   :  { %v447_v40 = vadd.f32 %v952_v35, %v446_v39  ;;  %450 = vadd.xlane.f32.xlu0 %v444_v37  ;;  %v1089_v41 = vpop.f32.mrb[7].mxu0  ;;  %v454_v42 = vmul.f32 %v444_v37, %v444_v37 }
 0x436   :  { %452 = vadd.xlane.f32.xlu1 %v447_v40  ;;  %v455_v43 = vmul.f32 %v447_v40, %v447_v40 }
 0x438   :  { %456 = vadd.xlane.f32.xlu0 %v454_v42 }
 0x43a   :  { %458 = vadd.xlane.f32.xlu1 %v455_v43 }
 0x4c1   :  { %v451_v52 = vpop.xlane.xlu0 %450 }
 0x4c2   :  { %v460_v53 = vmul.f32 0.015625, %v451_v52 }
 0x4c3   :  { %v453_v54 = vpop.xlane.xlu1 %452 }
 0x4c4   :  { %v461_v55 = vmul.f32 0.015625, %v453_v54  ;;  %v464_v57 = vmul.f32 %v460_v53, %v460_v53  ;;  %v479_v5 = vsub.f32 %v444_v37, %v460_v53  ;;  %v973_v54 = vld [vmem:[#allocation8 + $0xb] ss:$0 sm:$0xff] }
 0x4c5   :  { %v457_v56 = vpop.xlane.xlu0 %456 }
 0x4c6   :  { %v462_v58 = vmul.f32 0.015625, %v457_v56  ;;  %v465_v60 = vmul.f32 %v461_v55, %v461_v55  ;;  %v480_v9 = vsub.f32 %v447_v40, %v461_v55 }
 0x4c7   :  { %v459_v59 = vpop.xlane.xlu1 %458 }
 0x4c8   :  { %v466_v61 = vsub.f32 %v462_v58, %v464_v57  ;;  %v463_v62 = vmul.f32 0.015625, %v459_v59 }
 0x4ca   :  { %v468_v63 = vadd.f32 1e-05, %v466_v61  ;;  %v467_v1 = vsub.f32 %v463_v62, %v465_v60 }
 0x4cc   :  { %1211 = vrsqrt.f32 %v468_v63  ;;  %v469_v2 = vadd.f32 1e-05, %v467_v1  ;;  %v974_v1 = vld [vmem:[#allocation8 + $0xc] ss:$0 sm:$0xff] }
 0x4ce   :  { %1213 = vrsqrt.f32 %v469_v2 }
 0x4d6   :  { %v1212_v4 = vpop.eup %1211 }
 0x4d7   :  { %v477_v6 = vmul.f32 %v1212_v4, %v961_v3 }
 0x4d8   :  { %v1214_v7 = vpop.eup %1213 }
 0x4d9   :  { %v478_v10 = vmul.f32 %v1214_v7, %v961_v3  ;;  %v481_v11 = vmul.f32 %v479_v5, %v477_v6 }
 0x4db   :  { %v482_v12 = vmul.f32 %v480_v9, %v478_v10  ;;  %v488_v13 = vadd.f32 %v962_v8, %v481_v11  ;;  %v1195_v10 = vld [vmem:[#allocation7 + $0x100] sm:$0xff]   ;;  %v1196_v11 = vld [vmem:[#allocation7 + $0x108] sm:$0xff]  }
 0x4dd   :  { %v489_v14 = vadd.f32 %v962_v8, %v482_v12  ;;  %v490_v15 = vmax.f32 %v488_v13, 0.0  ;;  %v1197_v12 = vld [vmem:[#allocation7 + $0x110] sm:$0xff]   ;;  %v1198_v13 = vld [vmem:[#allocation7 + $0x118] sm:$0xff]  }
 0x4df   :  { %v491_v16 = vmax.f32 %v489_v14, 0.0  ;;  %v1199_v14 = vld [vmem:[#allocation7 + $0x120] sm:$0xff]  }
 0x4e1   :  { %v492_v17 = vpack.c.bf16 %v491_v16, %v490_v15  ;;  %v1200_v15 = vld [vmem:[#allocation7 + $0x128] sm:$0xff]   ;;  %v1201_v16 = vld [vmem:[#allocation7 + $0x130] sm:$0xff]  }
 0x4e3   :  { %1107 = vmatmul.mubr.bf16.vlgmr.msra.gmra.mrb[4].mxu1 %v492_v17  ;;  %v1202_v17 = vld [vmem:[#allocation7 + $0x138] sm:$0xff]  }
 0x4e4   :  { %1146 = vmatprep.mubr.msk.bf16.mxu1 %vm1354_vm0, %v1353_v0  ;;  %1131 = vmatpush3.bf16.msra.mxu1 %v1195_v10 }
 0x4e5   :  { %1132 = vmatprep.subr.bf16.mxu1 %v1353_v0 }
 0x4e8   :  { %1133 = vmatpush3.bf16.msra.mxu1 %v1196_v11 }
 0x4e9   :  { %1134 = vmatprep.subr.bf16.mxu1 %v1353_v0 }
 0x4ec   :  { %1135 = vmatpush3.bf16.msra.mxu1 %v1197_v12 }
 0x4ed   :  { %1136 = vmatprep.subr.bf16.mxu1 %v1353_v0 }
 0x4f0   :  { %1137 = vmatpush3.bf16.msra.mxu1 %v1198_v13 }
 0x4f1   :  { %1138 = vmatprep.subr.bf16.mxu1 %v1353_v0 }
 0x4f4   :  { %1139 = vmatpush3.bf16.msra.mxu1 %v1199_v14 }
 0x4f5   :  { %1140 = vmatprep.subr.bf16.mxu1 %v1353_v0 }
 0x4f8   :  { %1141 = vmatpush3.bf16.msra.mxu1 %v1200_v15 }
 0x4f9   :  { %1142 = vmatprep.subr.bf16.mxu1 %v1353_v0 }
 0x4fc   :  { %1143 = vmatpush3.bf16.msra.mxu1 %v1201_v16 }
 0x4fd   :  { %1144 = vmatprep.subr.bf16.mxu1 %v1353_v0 }
 0x500   :  { %1145 = vmatpush3.bf16.msra.mxu1 %v1202_v17 }
 0x5b6   :  { %v597_v19 = vpop.f32.mrb[4].mxu1 }
 0x5b7   :  { %v598_v20 = vadd.f32 %v963_v18, %v597_v19  ;;  %v1108_v21 = vpop.f32.mrb[5].mxu1 }
 0x5b8   :  { %v600_v22 = vpop.f32.mrb[6].mxu1 }
 0x5b9   :  { %v601_v23 = vadd.f32 %v963_v18, %v600_v22  ;;  %604 = vadd.xlane.f32.xlu0 %v598_v20  ;;  %v1109_v24 = vpop.f32.mrb[7].mxu1  ;;  %v608_v25 = vmul.f32 %v598_v20, %v598_v20 }
 0x5bb   :  { %606 = vadd.xlane.f32.xlu1 %v601_v23  ;;  %v609_v26 = vmul.f32 %v601_v23, %v601_v23 }
 0x5bd   :  { %610 = vadd.xlane.f32.xlu0 %v608_v25 }
 0x5bf   :  { %612 = vadd.xlane.f32.xlu1 %v609_v26 }
 0x646   :  { %v605_v35 = vpop.xlane.xlu0 %604 }
 0x647   :  { %v614_v36 = vmul.f32 0.015625, %v605_v35 }
 0x648   :  { %v607_v37 = vpop.xlane.xlu1 %606 }
 0x649   :  { %v615_v38 = vmul.f32 0.015625, %v607_v37  ;;  %v618_v40 = vmul.f32 %v614_v36, %v614_v36  ;;  %v633_v51 = vsub.f32 %v598_v20, %v614_v36  ;;  %v984_v36 = vld [vmem:[#allocation8 + $0xe] ss:$0 sm:$0xff] }
 0x64a   :  { %v611_v39 = vpop.xlane.xlu0 %610 }
 0x64b   :  { %v616_v41 = vmul.f32 0.015625, %v611_v39  ;;  %v619_v43 = vmul.f32 %v615_v38, %v615_v38  ;;  %v634_v55 = vsub.f32 %v601_v23, %v615_v38 }
 0x64c   :  { %v613_v42 = vpop.xlane.xlu1 %612 }
 0x64d   :  { %v620_v44 = vsub.f32 %v616_v41, %v618_v40  ;;  %v617_v45 = vmul.f32 0.015625, %v613_v42 }
 0x64f   :  { %v622_v46 = vadd.f32 1e-05, %v620_v44  ;;  %v621_v47 = vsub.f32 %v617_v45, %v619_v43 }
 0x651   :  { %1215 = vrsqrt.f32 %v622_v46  ;;  %v623_v48 = vadd.f32 1e-05, %v621_v47  ;;  %v985_v46 = vld [vmem:[#allocation8 + $0xf] ss:$0 sm:$0xff] }
 0x653   :  { %1217 = vrsqrt.f32 %v623_v48 }
 0x65b   :  { %v1216_v50 = vpop.eup %1215 }
 0x65c   :  { %v631_v52 = vmul.f32 %v1216_v50, %v972_v49 }
 0x65d   :  { %v1218_v53 = vpop.eup %1217 }
 0x65e   :  { %v632_v56 = vmul.f32 %v1218_v53, %v972_v49  ;;  %v635_v57 = vmul.f32 %v633_v51, %v631_v52 }
 0x660   :  { %v636_v58 = vmul.f32 %v634_v55, %v632_v56  ;;  %v642_v59 = vadd.f32 %v973_v54, %v635_v57 }
 0x662   :  { %v643_v60 = vadd.f32 %v973_v54, %v636_v58  ;;  %v644_v61 = vmax.f32 %v642_v59, 0.0 }
 0x664   :  { %v645_v62 = vmax.f32 %v643_v60, 0.0 }
 0x666   :  { %v646_v63 = vpack.c.bf16 %v645_v62, %v644_v61 }
 0x668   :  { %1127 = vmatmul.mubr.bf16.vlgmr.msra.gmra.mrb[8].mxu0 %v646_v63 }
 0x73b   :  { %v751_v2 = vpop.f32.mrb[8].mxu0 }
 0x73c   :  { %v752_v3 = vadd.f32 %v974_v1, %v751_v2  ;;  %v1128_v4 = vpop.f32.mrb[9].mxu0 }
 0x73d   :  { %v754_v5 = vpop.f32.mrb[10].mxu0 }
 0x73e   :  { %v755_v6 = vadd.f32 %v974_v1, %v754_v5  ;;  %758 = vadd.xlane.f32.xlu0 %v752_v3  ;;  %v1129_v7 = vpop.f32.mrb[11].mxu0  ;;  %v762_v8 = vmul.f32 %v752_v3, %v752_v3 }
 0x740   :  { %760 = vadd.xlane.f32.xlu1 %v755_v6  ;;  %v763_v9 = vmul.f32 %v755_v6, %v755_v6 }
 0x742   :  { %764 = vadd.xlane.f32.xlu0 %v762_v8 }
 0x744   :  { %766 = vadd.xlane.f32.xlu1 %v763_v9 }
 0x7cb   :  { %v759_v18 = vpop.xlane.xlu0 %758 }
 0x7cc   :  { %v768_v19 = vmul.f32 0.015625, %v759_v18 }
 0x7cd   :  { %v761_v20 = vpop.xlane.xlu1 %760 }
 0x7ce   :  { %v769_v21 = vmul.f32 0.015625, %v761_v20  ;;  %v772_v23 = vmul.f32 %v768_v19, %v768_v19  ;;  %v787_v0 = vsub.f32 %v752_v3, %v768_v19 }
 0x7cf   :  { %v765_v22 = vpop.xlane.xlu0 %764 }
 0x7d0   :  { %v770_v24 = vmul.f32 0.015625, %v765_v22  ;;  %v773_v26 = vmul.f32 %v769_v21, %v769_v21  ;;  %v788_v37 = vsub.f32 %v755_v6, %v769_v21 }
 0x7d1   :  { %v767_v25 = vpop.xlane.xlu1 %766 }
 0x7d2   :  { %v774_v27 = vsub.f32 %v770_v24, %v772_v23  ;;  %v771_v28 = vmul.f32 0.015625, %v767_v25 }
 0x7d4   :  { %v776_v29 = vadd.f32 1e-05, %v774_v27  ;;  %v775_v30 = vsub.f32 %v771_v28, %v773_v26 }
 0x7d6   :  { %1219 = vrsqrt.f32 %v776_v29  ;;  %v777_v31 = vadd.f32 1e-05, %v775_v30 }
 0x7d8   :  { %1221 = vrsqrt.f32 %v777_v31 }
 0x7e0   :  { %v1220_v33 = vpop.eup %1219 }
 0x7e1   :  { %v785_v34 = vmul.f32 %v1220_v33, %v983_v32 }
 0x7e2   :  { %v1222_v35 = vpop.eup %1221 }
 0x7e3   :  { %v786_v38 = vmul.f32 %v1222_v35, %v983_v32  ;;  %v789_v39 = vmul.f32 %v787_v0, %v785_v34 }
 0x7e5   :  { %v790_v40 = vmul.f32 %v788_v37, %v786_v38  ;;  %v796_v41 = vadd.f32 %v984_v36, %v789_v39 }
 0x7e7   :  { %v797_v42 = vadd.f32 %v984_v36, %v790_v40  ;;  %v798_v43 = vmax.f32 %v796_v41, 0.0 }
 0x7e9   :  { %v799_v44 = vmax.f32 %v797_v42, 0.0 }
 0x7eb   :  { %v800_v45 = vpack.c.bf16 %v799_v44, %v798_v43 }
 0x7ed   :  { %1147 = vmatmul.mubr.bf16.vlgmr.msra.gmra.mrb[8].mxu1 %v800_v45 }
 0x8c0   :  { %v905_v47 = vpop.f32.mrb[8].mxu1 }
 0x8c1   :  { %v906_v48 = vadd.f32 %v985_v46, %v905_v47  ;;  %v1148_v49 = vpop.f32.mrb[9].mxu1 }
 0x8c2   :  { %v908_v50 = vpop.f32.mrb[10].mxu1 }
 0x8c3   :  { %1223 = vtanh.f32 %v906_v48  ;;  %v909_v51 = vadd.f32 %v985_v46, %v908_v50  ;;  %v1149_v52 = vpop.f32.mrb[11].mxu1 }
 0x8c5   :  { %1225 = vtanh.f32 %v909_v51 }
 0x8cd   :  { %v1224_v53 = vpop.eup %1223 }
 0x8ce   :  { %914 = vst [vmem:[#allocation10] sm:$0xff] %v1224_v53 }
 0x8cf   :  { %v1226_v54 = vpop.eup %1225 }
 0x8d0   :  { %915 = vst [vmem:[#allocation10 + $0x8] sm:$0xff] %v1226_v54 }
 0x8d1   :  { %1326 = shalt.err (!%p1323_p8)
}
 0x8d2   :  { %s1327_s17 = scalar_lea.hbm %s1521_s4, 256 }
 0x8d3   :  { %p1328_p9 = scmp.ne.s32.totalorder %s1521_s4, %s1327_s17  ;;  %p1331_p10 = scmp.lt.u32.totalorder %s1327_s17, %s1521_s4 }
 0x8d5   :  { %p1333_p11 = pnand %p1331_p10, %p1328_p9 }
 0x8d7   :  { %1336 = shalt.err (!%p1333_p11)
}
 0x8d8   :  { %927 = dma.vmem_to_hbm [thread:$0]  %s922_s26, 256, %s1521_s4, [#allocation4], %s1349_s1, %s1349_s1, %s1350_s13  }
 0x8d9   :  { %1343 = dma.done.wait [#allocation4], 256  }
 0x8da   :  { %1344 = vsyncadd [#allocation4], 4294967040 }
 0x8db   :  { %931 = vsyncpa [#allocation3], 1 }
 0x8dc   :  { %932 = vsyncpa [#allocation6], 1 }
 0x8dd   :  { %933 = vsyncpa [#allocation9], 1 }
 0x8de   :  { %934 = vsyncpa [#allocation4], 1 }

</bundles_post_ra>
